<compile_context>
chip_gen: v5e
topology: v5e:2x2
jax: 0.10.0
libtpu: 0.0.40
codegen_flags: <defaults>
</compile_context>

<pallas_src>
import jax
import jax.numpy as jnp
from jax.experimental import pallas as pl
from jax.experimental.pallas import tpu as pltpu


def _round_up(v, m):
    return ((v + m - 1) // m) * m


def _choose_row_tile(n_pad):
    # Largest row tile (multiple of 128) dividing n_pad whose double-buffered
    # bf16 A tile stays under ~8 MiB.
    for cand in (1024, 512, 256, 128):
        if n_pad % cand == 0 and 2 * cand * n_pad * 2 <= 8 * 1024 * 1024:
            return cand
    return 128


def _sage1_kernel(a_ref, deg_ref, x_full_ref, x_row_ref, w1_ref, b1_ref,
                  h1_ref, z_ref):
    # mean aggregation: (raw-count A row tile) @ x, scaled by 1/deg (EUP).
    agg = jnp.dot(a_ref[...], x_full_ref[...],
                  preferred_element_type=jnp.float32)
    agg = agg * pl.reciprocal(deg_ref[...], approx=True)
    # fused projection: [agg | x_row] @ [Wl1 ; Wr1]  (single MXU pass)
    cp = x_row_ref.shape[1]
    z_ref[:, :cp] = agg.astype(z_ref.dtype)
    z_ref[:, cp:] = x_row_ref[...]
    h = jnp.dot(z_ref[...], w1_ref[...],
                preferred_element_type=jnp.float32) + b1_ref[...]
    h1_ref[...] = jnp.maximum(h, 0.0).astype(h1_ref.dtype)


def _sage2_fc_kernel(a_ref, deg_ref, h_full_ref, h_row_ref, w2_ref, b2_ref,
                     wfc_ref, bfc_ref, out_ref, z_ref):
    agg = jnp.dot(a_ref[...], h_full_ref[...],
                  preferred_element_type=jnp.float32)
    agg = agg * pl.reciprocal(deg_ref[...], approx=True)
    hp = h_row_ref.shape[1]
    z_ref[:, :hp] = agg.astype(z_ref.dtype)
    z_ref[:, hp:] = h_row_ref[...]
    h2 = jnp.maximum(
        jnp.dot(z_ref[...], w2_ref[...],
                preferred_element_type=jnp.float32) + b2_ref[...], 0.0)
    out_ref[...] = (jnp.dot(h2.astype(jnp.bfloat16), wfc_ref[...],
                            preferred_element_type=jnp.float32)
                    + bfc_ref[...])


def household_assignment_gnn(x, edge_index, params):
    """Forward pass. x: (N, C_in) float32, edge_index: (2, E) int32.

    Returns (N, num_households) float32 logits.
    """
    wl1, wr1, b1, wl2, wr2, b2, wfc, bfc = params
    n, c_in = x.shape
    hidden = wl1.shape[1]
    num_hh = wfc.shape[1]

    f32, bf16 = jnp.float32, jnp.bfloat16

    # --- lane-dense padded sizes (multiples of 128) ---
    n_pad = _round_up(n, 128)
    c_pad = _round_up(c_in, 128)
    h_pad = _round_up(hidden, 128)
    o_pad = _round_up(num_hh, 128)
    tm = _choose_row_tile(n_pad)
    grid = (n_pad // tm,)

    src, dst = edge_index[0], edge_index[1]

    # Raw-count adjacency in bf16 (duplicate edges counted with multiplicity,
    # matching scatter-mean semantics); padded rows/cols stay zero.
    adj = jnp.zeros((n_pad, n_pad), bf16).at[dst, src].add(1.0)
    # In-degree, clamped so isolated / padded nodes divide by 1 (zero aggr).
    deg = jnp.zeros((n_pad,), f32).at[dst].add(1.0)
    deg = jnp.where(deg > 0, deg, 1.0).reshape(n_pad, 1)

    def pad2(a, r, c):
        return jnp.pad(a, ((0, r - a.shape[0]), (0, c - a.shape[1])))

    x_p = pad2(x, n_pad, c_pad).astype(bf16)
    # stacked per-layer projections so [agg | x] @ [Wl ; Wr] is one matmul.
    w1 = jnp.concatenate([pad2(wl1, c_pad, h_pad), pad2(wr1, c_pad, h_pad)],
                         axis=0).astype(bf16)
    w2 = jnp.concatenate([pad2(wl2, h_pad, h_pad), pad2(wr2, h_pad, h_pad)],
                         axis=0).astype(bf16)
    wfc_p = pad2(wfc, h_pad, o_pad).astype(bf16)
    b1_p = pad2(b1, 1, h_pad).astype(f32)
    b2_p = pad2(b2, 1, h_pad).astype(f32)
    bfc_p = pad2(bfc, 1, o_pad).astype(f32)

    cparams = pltpu.CompilerParams(
        dimension_semantics=("parallel",),      # 2 TCs on v7x; no-op on v5e/v6e
        vmem_limit_bytes=32 * 1024 * 1024)

    def row(bs):
        return pl.BlockSpec(bs, lambda i: (i, 0))

    def resident(bs):
        return pl.BlockSpec(bs, lambda i: (0, 0))

    # ---- layer 1: h1 = relu([A@x / deg | x] @ [Wl1;Wr1] + b1) ----
    h1 = pl.pallas_call(
        _sage1_kernel,
        grid=grid,
        out_shape=jax.ShapeDtypeStruct((n_pad, h_pad), bf16),
        in_specs=[row((tm, n_pad)),            # A row tile (raw counts)
                  row((tm, 1)),                # deg for these rows
                  resident((n_pad, c_pad)),    # x, all rows (aggregation)
                  row((tm, c_pad)),            # x, this tile's rows (root term)
                  resident((2 * c_pad, h_pad)),
                  resident((1, h_pad))],
        out_specs=row((tm, h_pad)),
        scratch_shapes=[pltpu.VMEM((tm, 2 * c_pad), bf16)],
        compiler_params=cparams,
    )(adj, deg, x_p, x_p, w1, b1_p)

    # ---- layer 2 + fc: relu([A@h1 / deg | h1] @ [Wl2;Wr2] + b2) @ Wfc + bfc ----
    out = pl.pallas_call(
        _sage2_fc_kernel,
        grid=grid,
        out_shape=jax.ShapeDtypeStruct((n_pad, o_pad), f32),
        in_specs=[row((tm, n_pad)),
                  row((tm, 1)),
                  resident((n_pad, h_pad)),
                  row((tm, h_pad)),
                  resident((2 * h_pad, h_pad)),
                  resident((1, h_pad)),
                  resident((h_pad, o_pad)),
                  resident((1, o_pad))],
        out_specs=row((tm, o_pad)),
        scratch_shapes=[pltpu.VMEM((tm, 2 * h_pad), bf16)],
        compiler_params=cparams,
    )(adj, deg, h1, h1, w2, b2_p, wfc_p, bfc_p)

    return out[:n, :num_hh]


def init_params(key, in_channels, hidden_channels, num_households):
    """Deterministic synthetic parameters matching the module's shapes."""
    ks = jax.random.split(key, 8)
    s = 0.1
    # SAGEConv1: lin_l (aggregated neighbors, carries bias), lin_r (root)
    wl1 = s * jax.random.normal(ks[0], (in_channels, hidden_channels), jnp.float32)
    wr1 = s * jax.random.normal(ks[1], (in_channels, hidden_channels), jnp.float32)
    b1 = s * jax.random.normal(ks[2], (1, hidden_channels), jnp.float32)
    # SAGEConv3
    wl2 = s * jax.random.normal(ks[3], (hidden_channels, hidden_channels), jnp.float32)
    wr2 = s * jax.random.normal(ks[4], (hidden_channels, hidden_channels), jnp.float32)
    b2 = s * jax.random.normal(ks[5], (1, hidden_channels), jnp.float32)
    # fc: torch Linear weight is (num_households, hidden) -> stored transposed
    wfc = s * jax.random.normal(ks[6], (hidden_channels, num_households), jnp.float32)
    bfc = s * jax.random.normal(ks[7], (1, num_households), jnp.float32)
    return (wl1, wr1, b1, wl2, wr2, b2, wfc, bfc)


def _reference(x, edge_index, params):
    """Pure-JAX f32 reference of the same forward (for sanity checking)."""
    n = x.shape[0]
    src, dst = edge_index[0], edge_index[1]
    adj = jnp.zeros((n, n), dtype=jnp.float32).at[dst, src].add(1.0)
    deg = jnp.sum(adj, axis=1, keepdims=True)
    adj = adj / jnp.where(deg > 0, deg, 1.0)
    wl1, wr1, b1, wl2, wr2, b2, wfc, bfc = params
    h1 = jnp.maximum(adj @ x @ wl1 + x @ wr1 + b1, 0.0)
    h2 = jnp.maximum(adj @ h1 @ wl2 + h1 @ wr2 + b2, 0.0)
    return h2 @ wfc + bfc


if __name__ == "__main__":
    key = jax.random.PRNGKey(0)
    k_x, k_e, k_p = jax.random.split(key, 3)

    num_persons = 16        # N person nodes
    in_channels = 8         # person feature dim
    hidden_channels = 32
    num_households = 8
    num_edges = 48

    x = jax.random.normal(k_x, (num_persons, in_channels), jnp.float32)
    edge_index = jax.random.randint(k_e, (2, num_edges), 0, num_persons,
                                    dtype=jnp.int32)

    params = init_params(k_p, in_channels, hidden_channels, num_households)

    out = jax.block_until_ready(household_assignment_gnn(x, edge_index, params))
    ref = _reference(x, edge_index, params)

    assert out.shape == (num_persons, num_households)
    # bf16 operands + approx reciprocal -> loosened tolerance vs pure-f32 ref.
    assert jnp.allclose(out, ref, atol=3e-2, rtol=3e-2), \
        float(jnp.max(jnp.abs(out - ref)))

    print("KERNEL_OK")
</pallas_src>

<mosaic_0001>
module attributes {stable_mosaic.version = 11 : i64} {
  func.func @_sage1_kernel(%arg0: i32, %arg1: memref<128x128xbf16, #tpu.memory_space<vmem>>, %arg2: memref<128x1xf32, #tpu.memory_space<vmem>>, %arg3: memref<128x128xbf16, #tpu.memory_space<vmem>>, %arg4: memref<128x128xbf16, #tpu.memory_space<vmem>>, %arg5: memref<256x128xbf16, #tpu.memory_space<vmem>>, %arg6: memref<1x128xf32, #tpu.memory_space<vmem>>, %arg7: memref<128x128xbf16, #tpu.memory_space<vmem>>, %arg8: memref<128x256xbf16, #tpu.memory_space<vmem>>) attributes {dimension_semantics = [#tpu.dimension_semantics<parallel>], iteration_bounds = array<i64: 1>, scalar_prefetch = 0 : i64, scratch_operands = 1 : i64, tpu.core_type = #tpu.core_type<tc>, window_params = [{transform_indices = @transform_0, window_bounds = array<i64: 128, 128>}, {transform_indices = @transform_1, window_bounds = array<i64: 128, 1>}, {pipeline_mode = #tpu.pipeline_mode<synchronous>, transform_indices = @transform_2, window_bounds = array<i64: 128, 128>}, {transform_indices = @transform_3, window_bounds = array<i64: 128, 128>}, {pipeline_mode = #tpu.pipeline_mode<synchronous>, transform_indices = @transform_4, window_bounds = array<i64: 256, 128>}, {pipeline_mode = #tpu.pipeline_mode<synchronous>, transform_indices = @transform_5, window_bounds = array<i64: 1, 128>}, {transform_indices = @transform_6, window_bounds = array<i64: 128, 128>}]} {
    %c0 = arith.constant 0 : index
    %c0_0 = arith.constant 0 : index
    %0 = vector.load %arg1[%c0, %c0_0] : memref<128x128xbf16, #tpu.memory_space<vmem>>, vector<128x128xbf16>
    %c0_1 = arith.constant 0 : index
    %c0_2 = arith.constant 0 : index
    %1 = vector.load %arg3[%c0_1, %c0_2] : memref<128x128xbf16, #tpu.memory_space<vmem>>, vector<128x128xbf16>
    %cst = arith.constant dense<0.000000e+00> : vector<128x128xf32>
    %2 = tpu.matmul %0, %1, %cst {dimension_numbers = #tpu.dot_dimension_numbers<[1], [0], [0], [1], [0, 0, 1, 1], [], []>} : vector<128x128xbf16>, vector<128x128xbf16>, vector<128x128xf32> -> vector<128x128xf32>
    %c0_3 = arith.constant 0 : index
    %c0_4 = arith.constant 0 : index
    %3 = vector.load %arg2[%c0_3, %c0_4] : memref<128x1xf32, #tpu.memory_space<vmem>>, vector<128x1xf32>
    %4 = tpu.reciprocal %3 {approx = true} : vector<128x1xf32> -> vector<128x1xf32>
    %5 = vector.broadcast %4 : vector<128x1xf32> to vector<128x128xf32>
    %6 = arith.mulf %2, %5 : vector<128x128xf32>
    %7 = arith.truncf %6 : vector<128x128xf32> to vector<128x128xbf16>
    %c0_5 = arith.constant 0 : index
    %c0_6 = arith.constant 0 : index
    %8 = vector.load %arg8[%c0_5, %c0_6] : memref<128x256xbf16, #tpu.memory_space<vmem>>, vector<128x128xbf16>
    tpu.vector_store %arg8[%c0_5, %c0_6], %7 {strides = array<i32>} : memref<128x256xbf16, #tpu.memory_space<vmem>>, vector<128x128xbf16>,
    %c0_7 = arith.constant 0 : index
    %c0_8 = arith.constant 0 : index
    %9 = vector.load %arg4[%c0_7, %c0_8] : memref<128x128xbf16, #tpu.memory_space<vmem>>, vector<128x128xbf16>
    %c0_9 = arith.constant 0 : index
    %c128 = arith.constant 128 : index
    %10 = vector.load %arg8[%c0_9, %c128] : memref<128x256xbf16, #tpu.memory_space<vmem>>, vector<128x128xbf16>
    tpu.vector_store %arg8[%c0_9, %c128], %9 {strides = array<i32>} : memref<128x256xbf16, #tpu.memory_space<vmem>>, vector<128x128xbf16>,
    %c0_10 = arith.constant 0 : index
    %c0_11 = arith.constant 0 : index
    %11 = vector.load %arg8[%c0_10, %c0_11] : memref<128x256xbf16, #tpu.memory_space<vmem>>, vector<128x256xbf16>
    %c0_12 = arith.constant 0 : index
    %c0_13 = arith.constant 0 : index
    %12 = vector.load %arg5[%c0_12, %c0_13] : memref<256x128xbf16, #tpu.memory_space<vmem>>, vector<256x128xbf16>
    %cst_14 = arith.constant dense<0.000000e+00> : vector<128x128xf32>
    %13 = tpu.matmul %11, %12, %cst_14 {dimension_numbers = #tpu.dot_dimension_numbers<[1], [0], [0], [1], [0, 0, 1, 1], [], []>} : vector<128x256xbf16>, vector<256x128xbf16>, vector<128x128xf32> -> vector<128x128xf32>
    %c0_15 = arith.constant 0 : index
    %c0_16 = arith.constant 0 : index
    %14 = vector.load %arg6[%c0_15, %c0_16] : memref<1x128xf32, #tpu.memory_space<vmem>>, vector<1x128xf32>
    %15 = vector.broadcast %14 : vector<1x128xf32> to vector<128x128xf32>
    %16 = arith.addf %13, %15 : vector<128x128xf32>
    %cst_17 = arith.constant 0.000000e+00 : f32
    %17 = vector.broadcast %cst_17 : f32 to vector<128x128xf32>
    %18 = arith.maximumf %16, %17 : vector<128x128xf32>
    %19 = arith.truncf %18 : vector<128x128xf32> to vector<128x128xbf16>
    %c0_18 = arith.constant 0 : index
    %c0_19 = arith.constant 0 : index
    %20 = vector.load %arg7[%c0_18, %c0_19] : memref<128x128xbf16, #tpu.memory_space<vmem>>, vector<128x128xbf16>
    tpu.vector_store %arg7[%c0_18, %c0_19], %19 {strides = array<i32>} : memref<128x128xbf16, #tpu.memory_space<vmem>>, vector<128x128xbf16>,
    return
  }
  func.func @transform_0(%arg0: i32) -> (i32, i32) {
    %c0_i32 = arith.constant 0 : i32
    %c0_i32_0 = arith.constant 0 : i32
    return %arg0, %c0_i32 : i32, i32
  }
  func.func @transform_1(%arg0: i32) -> (i32, i32) {
    %c0_i32 = arith.constant 0 : i32
    %c0_i32_0 = arith.constant 0 : i32
    return %arg0, %c0_i32 : i32, i32
  }
  func.func @transform_2(%arg0: i32) -> (i32, i32) {
    %c0_i32 = arith.constant 0 : i32
    %c0_i32_0 = arith.constant 0 : i32
    %c0_i32_1 = arith.constant 0 : i32
    return %c0_i32, %c0_i32_0 : i32, i32
  }
  func.func @transform_3(%arg0: i32) -> (i32, i32) {
    %c0_i32 = arith.constant 0 : i32
    %c0_i32_0 = arith.constant 0 : i32
    return %arg0, %c0_i32 : i32, i32
  }
  func.func @transform_4(%arg0: i32) -> (i32, i32) {
    %c0_i32 = arith.constant 0 : i32
    %c0_i32_0 = arith.constant 0 : i32
    %c0_i32_1 = arith.constant 0 : i32
    return %c0_i32, %c0_i32_0 : i32, i32
  }
  func.func @transform_5(%arg0: i32) -> (i32, i32) {
    %c0_i32 = arith.constant 0 : i32
    %c0_i32_0 = arith.constant 0 : i32
    %c0_i32_1 = arith.constant 0 : i32
    return %c0_i32, %c0_i32_0 : i32, i32
  }
  func.func @transform_6(%arg0: i32) -> (i32, i32) {
    %c0_i32 = arith.constant 0 : i32
    %c0_i32_0 = arith.constant 0 : i32
    return %arg0, %c0_i32 : i32, i32
  }
}

</mosaic_0001>

<bundles_post_ra>
// kernel: tpu_custom_call.1
= control target key start
LH: loop header
LB: loop body
LE: loop exit
PB: predicated region body
PF: predicated region fallthrough
CT: control target
= control target key end

     0   :  { %11 = vsyncpa [#allocation4], 0  ;;  %s1481_s0 = inlined_call_operand.hbm [shape: bf16[128,128], index: 0, kind: input, shape index: {}]   ;;  %s1482_s1 = inlined_call_operand.vmem [shape: f32[128,1], index: 1, kind: input, shape index: {}]   ;;  %s1483_s2 = inlined_call_operand.hbm [shape: bf16[128,128], index: 2, kind: input, shape index: {}]   ;;  %s1484_s3 = inlined_call_operand.hbm [shape: bf16[128,128], index: 3, kind: input, shape index: {}]   ;;  %s1485_s4 = inlined_call_operand.vmem [shape: bf16[256,128], index: 4, kind: input, shape index: {}]   ;;  %s1486_s5 = inlined_call_operand.vmem [shape: f32[1,128], index: 5, kind: input, shape index: {}]   ;;  %s1487_s6 = inlined_call_operand.hbm [shape: bf16[128,128], index: 6, kind: output, shape index: {}]  }
   0x1   :  { %12 = vsyncpa [#allocation7], 0 }
   0x2   :  { %13 = vsyncpa [#allocation5], 0  ;;  %s33_s23 = sshll.u32 %s1483_s2, 4  ;;  %s1290_s24 = smov [#allocation6]   ;;  %s34_s23 = int_to_ptr.hbm [resolvable:$true] %s33_s23 }
   0x3   :  { %s35_s25 = sshll.u32 %s1290_s24, 4  ;;  %s18_s28 = sshll.u32 %s1481_s0, 4  ;;  %s36_s25 = int_to_ptr.vmem [resolvable:$true] %s35_s25  ;;  %s19_s28 = int_to_ptr.hbm [resolvable:$true] %s18_s28 }
   0x4   :  { %s1291_s29 = smov 64   ;;  %s1292_s30 = smov 4  }
   0x5   :  { %41 = dma.hbm_to_vmem [thread:$0]  %s34_s23, 1024, %s36_s25, [#allocation7], %s1291_s29, %s1291_s29, %s1292_s30  }
   0x6   :  { %s1293_s7 = smov [#allocation3]   ;;  %s46_s2 = sshll.u32 %s1484_s3, 4  ;;  %s47_s2 = int_to_ptr.hbm [resolvable:$true] %s46_s2 }
   0x7   :  { %s20_s8 = sshll.u32 %s1293_s7, 4  ;;  %s1294_s0 = smov [#allocation8]   ;;  %s21_s8 = int_to_ptr.vmem [resolvable:$true] %s20_s8 }
   0x8   :  { %26 = dma.hbm_to_vmem [thread:$0]  %s19_s28, 1024, %s21_s8, [#allocation4], %s1291_s29, %s1291_s29, %s1292_s30  }
   0x9   :  { %s48_s11 = sshll.u32 %s1294_s0, 4  ;;  %s49_s11 = int_to_ptr.vmem [resolvable:$true] %s48_s11 }
   0xa   :  { %54 = dma.hbm_to_vmem [thread:$0]  %s47_s2, 1024, %s49_s11, [#allocation7], %s1291_s29, %s1291_s29, %s1292_s30  }
   0xb   :  { %1284 = dma.done.wait [#allocation4], 1024  }
   0xc   :  { %1285 = vsyncadd [#allocation4], 4294966272 }
   0xd   :  { %1286 = dma.done.wait [#allocation7], 2048  }
   0xe   :  { %1287 = vsyncadd [#allocation7], 4294965248  ;;  %v1295_v0 = vmov 0   ;;  %v1041_v1 = vld [vmem:[#allocation6 + $0x38] sm:$0xff]  ;;  %v248_v2 = vld [vmem:[%s1482_s1] sm:$0xff]  ;;  %s820_s27 = sshll.u32 %s1487_s6, 4  ;;  %s821_s27 = int_to_ptr.hbm [resolvable:$true] %s820_s27 }
   0xf   :  { %1152 = vset.pattern.permute.xlu0 %v1295_v0  ;;  %1153 = vset.pattern.permute.xlu1 %v1295_v0  ;;  %1156 = vrcp.f32 %v248_v2  ;;  %v1040_v3 = vld [vmem:[#allocation6 + $0x30] sm:$0xff]  ;;  %v249_v5 = vld [vmem:[%s1482_s1 + $0x8] sm:$0xff]  ;;  %v251_v8 = vld [vmem:[%s1482_s1 + $0x18] sm:$0xff] }
  0x10   :  { %1154 = vset.pattern.permute.xlu2 %v1295_v0  ;;  %199 = vmatpush.bf16.msra.mxu0 %v1041_v1  ;;  %v250_v4 = vld [vmem:[%s1482_s1 + $0x10] sm:$0xff]  ;;  %v1039_v6 = vld [vmem:[#allocation6 + $0x28] sm:$0xff]  ;;  %v1038_v10 = vld [vmem:[#allocation6 + $0x20] sm:$0xff] }
  0x11   :  { %1121 = vmatpush.bf16.msra.mxu3 %v1041_v1  ;;  %1158 = vrcp.f32 %v250_v4  ;;  %v252_v11 = vld [vmem:[%s1482_s1 + $0x20] sm:$0xff]  ;;  %v1037_v13 = vld [vmem:[#allocation6 + $0x18] sm:$0xff]  ;;  %v253_v14 = vld [vmem:[%s1482_s1 + $0x28] sm:$0xff] }
  0x12   :  { %1160 = vrcp.f32 %v249_v5  ;;  %v260_v16 = vld [vmem:[%s1482_s1 + $0x60] sm:$0xff]  ;;  %v1036_v17 = vld [vmem:[#allocation6 + $0x10] sm:$0xff]  ;;  %v263_v18 = vld [vmem:[%s1482_s1 + $0x78] sm:$0xff] }
  0x13   :  { %1162 = vrcp.f32 %v251_v8  ;;  %v1035_v20 = vld [vmem:[#allocation6 + $0x8] sm:$0xff]  ;;  %v254_v21 = vld [vmem:[%s1482_s1 + $0x30] sm:$0xff]  ;;  %v1034_v24 = vld [vmem:[#allocation6] sm:$0xff] }
  0x14   :  { %200 = vmatpush.bf16.msra.mxu0 %v1040_v3  ;;  %1164 = vrcp.f32 %v252_v11  ;;  %v256_v25 = vld [vmem:[%s1482_s1 + $0x40] sm:$0xff]  ;;  %v1032_v28 = vld [vmem:[#allocation3 + $0x30] sm:$0xff]  ;;  %v257_v29 = vld [vmem:[%s1482_s1 + $0x48] sm:$0xff] }
  0x15   :  { %1122 = vmatpush.bf16.msra.mxu3 %v1040_v3  ;;  %v1157_v7 = vpop.eup %1156  ;;  %1166 = vrcp.f32 %v253_v14  ;;  %v1026_v27 = vld [vmem:[#allocation3] sm:$0xff]  ;;  %v261_v31 = vld [vmem:[%s1482_s1 + $0x68] sm:$0xff]  ;;  %v259_v32 = vld [vmem:[%s1482_s1 + $0x58] sm:$0xff] }
  0x16   :  { %282 = vperm.xlu0 %1152, %v1157_v7   ;;  %1168 = vrcp.f32 %v260_v16  ;;  %v262_v33 = vld [vmem:[%s1482_s1 + $0x70] sm:$0xff]  ;;  %v1027_v39 = vld [vmem:[#allocation3 + $0x8] sm:$0xff]  ;;  %v1033_v40 = vld [vmem:[#allocation3 + $0x38] sm:$0xff] }
  0x17   :  { %v1159_v9 = vpop.eup %1158  ;;  %1170 = vrcp.f32 %v263_v18  ;;  %v255_v41 = vld [vmem:[%s1482_s1 + $0x38] sm:$0xff]  ;;  %v258_v42 = vld [vmem:[%s1482_s1 + $0x50] sm:$0xff]  ;;  %v1030_v47 = vld [vmem:[#allocation3 + $0x20] sm:$0xff] }
  0x18   :  { %201 = vmatpush.bf16.msra.mxu0 %v1039_v6  ;;  %292 = vperm.xlu1 %1153, %v1159_v9   ;;  %v1161_v12 = vpop.eup %1160  ;;  %1172 = vrcp.f32 %v254_v21  ;;  %v1028_v45 = vld [vmem:[#allocation3 + $0x10] sm:$0xff]  ;;  %v1029_v46 = vld [vmem:[#allocation3 + $0x18] sm:$0xff]  ;;  %v1031_v50 = vld [vmem:[#allocation3 + $0x28] sm:$0xff] }
  0x19   :  { %1123 = vmatpush.bf16.msra.mxu3 %v1039_v6  ;;  %v1163_v15 = vpop.eup %1162  ;;  %1174 = vrcp.f32 %v256_v25  ;;  %v1073_v48 = vld [vmem:[%s1485_s4 + $0x78] sm:$0xff]  ;;  %v1072_v49 = vld [vmem:[%s1485_s4 + $0x70] sm:$0xff]  ;;  %v1071_v51 = vld [vmem:[%s1485_s4 + $0x68] sm:$0xff] }
  0x1a   :  { %v1165_v19 = vpop.eup %1164  ;;  %1176 = vrcp.f32 %v261_v31  ;;  %717 = vmatpush.bf16.msra.mxu2 %v1073_v48  ;;  %v1065_v52 = vld [vmem:[%s1485_s4 + $0x38] sm:$0xff]  ;;  %v1070_v53 = vld [vmem:[%s1485_s4 + $0x60] sm:$0xff]  ;;  %v1064_v54 = vld [vmem:[%s1485_s4 + $0x30] sm:$0xff] }
  0x1b   :  { %v1167_v22 = vpop.eup %1166  ;;  %1178 = vrcp.f32 %v257_v29  ;;  %668 = vmatpush.bf16.msra.mxu1 %v1065_v52  ;;  %v1069_v55 = vld [vmem:[%s1485_s4 + $0x58] sm:$0xff]  ;;  %v1063_v56 = vld [vmem:[%s1485_s4 + $0x28] sm:$0xff]  ;;  %v1425_v57 = vld [vmem:[%s1485_s4 + $0x50] sm:$0xff] }
  0x1c   :  { %202 = vmatpush.bf16.msra.mxu0 %v1038_v10  ;;  %v1169_v23 = vpop.eup %1168  ;;  %1180 = vrcp.f32 %v259_v32  ;;  %v408_v58 = vld [vmem:[#allocation8] sm:$0xf]  ;;  %v409_v59 = vld [vmem:[#allocation8 + $0x4] sm:$0xf]  ;;  %v1067_v61 = vld [vmem:[%s1485_s4 + $0x48] sm:$0xff] }
  0x1d   :  { %1124 = vmatpush.bf16.msra.mxu3 %v1038_v10  ;;  %342 = vperm.xlu2 %1154, %v1169_v23   ;;  %v1171_v26 = vpop.eup %1170  ;;  %1182 = vrcp.f32 %v262_v33  ;;  %424 = vst [vmem:[#allocation2 + $0x4] sm:$0xf] %v408_v58  ;;  %v1062_v60 = vld [vmem:[%s1485_s4 + $0x20] sm:$0xff]  ;;  %v1061_v62 = vld [vmem:[%s1485_s4 + $0x18] sm:$0xff]  ;;  %v1060_v3 = vld [vmem:[%s1485_s4 + $0x10] sm:$0xff] }
  0x1e   :  { %287 = vperm.xlu0 %1152, %v1161_v12   ;;  %v1173_v30 = vpop.eup %1172  ;;  %1184 = vrcp.f32 %v255_v41  ;;  %718 = vmatpush.bf16.msra.mxu2 %v1072_v49  ;;  %425 = vst [vmem:[#allocation2 + $0xc] sm:$0xf] %v409_v59  ;;  %v1440_v63 = vld [vmem:[%s1485_s4 + $0x40] sm:$0xff]  ;;  %v1059_v4 = vld [vmem:[%s1485_s4 + $0x8] sm:$0xff]  ;;  %v413_v14 = vld [vmem:[#allocation8 + $0x14] sm:$0xf] }
  0x1f   :  { %v1175_v34 = vpop.eup %1174  ;;  %1186 = vrcp.f32 %v258_v42  ;;  %669 = vmatpush.bf16.msra.mxu1 %v1064_v54  ;;  %v410_v5 = vld [vmem:[#allocation8 + $0x8] sm:$0xf]  ;;  %v411_v6 = vld [vmem:[#allocation8 + $0xc] sm:$0xf]  ;;  %v1058_v7 = vld [vmem:[%s1485_s4] sm:$0xff] }
  0x20   :  { %203 = vmatpush.bf16.msra.mxu0 %v1037_v13  ;;  %297 = vperm.xlu1 %1153, %v1163_v15   ;;  %v1177_v35 = vpop.eup %1176  ;;  %426 = vst [vmem:[#allocation2 + $0x14] sm:$0xf] %v410_v5  ;;  %v414_v33 = vld [vmem:[#allocation8 + $0x18] sm:$0xf] }
  0x21   :  { %1125 = vmatpush.bf16.msra.mxu3 %v1037_v13  ;;  %v1179_v36 = vpop.eup %1178  ;;  %427 = vst [vmem:[#allocation2 + $0x1c] sm:$0xf] %v411_v6  ;;  %v412_v13 = vld [vmem:[#allocation8 + $0x10] sm:$0xf] }
  0x22   :  { %v1181_v37 = vpop.eup %1180  ;;  %719 = vmatpush.bf16.msra.mxu2 %v1071_v51  ;;  %428 = vst [vmem:[#allocation2 + $0x24] sm:$0xf] %v412_v13 }
  0x23   :  { %v1183_v38 = vpop.eup %1182  ;;  %670 = vmatpush.bf16.msra.mxu1 %v1063_v56  ;;  %429 = vst [vmem:[#allocation2 + $0x2c] sm:$0xf] %v413_v14 }
  0x24   :  { %204 = vmatpush.bf16.msra.mxu0 %v1036_v17  ;;  %v1185_v43 = vpop.eup %1184  ;;  %v1042_v0 = vld [vmem:[#allocation2 + $0x4] sm:$0xf]  ;;  %430 = vst [vmem:[#allocation2 + $0x34] sm:$0xf] %v414_v33 }
  0x25   :  { %1126 = vmatpush.bf16.msra.mxu3 %v1036_v17  ;;  %347 = vperm.xlu2 %1154, %v1177_v35   ;;  %v1187_v44 = vpop.eup %1186  ;;  %v902_v1 = vld [vmem:[#allocation2 + $0x8] sm:$0xf0] }
  0x26   :  { %302 = vperm.xlu0 %1152, %v1165_v19   ;;  %720 = vmatpush.bf16.msra.mxu2 %v1070_v53  ;;  %v905_v2 = vor.u32 %v1042_v0, %v902_v1 }
  0x27   :  { %671 = vmatpush.bf16.msra.mxu1 %v1062_v60  ;;  %v1044_v8 = vld [vmem:[#allocation2 + $0x14] sm:$0xf] }
  0x28   :  { %205 = vmatpush.bf16.msra.mxu0 %v1035_v20  ;;  %307 = vperm.xlu1 %1153, %v1167_v22   ;;  %v910_v9 = vld [vmem:[#allocation2 + $0x18] sm:$0xf0] }
  0x29   :  { %1127 = vmatpush.bf16.msra.mxu3 %v1035_v20  ;;  %v913_v10 = vor.u32 %v1044_v8, %v910_v9  ;;  %v1046_v22 = vld [vmem:[#allocation2 + $0x24] sm:$0xf] }
  0x2a   :  { %721 = vmatpush.bf16.msra.mxu2 %v1069_v55  ;;  %v918_v25 = vld [vmem:[#allocation2 + $0x28] sm:$0xf0] }
  0x2b   :  { %672 = vmatpush.bf16.msra.mxu1 %v1061_v62 }
  0x2c   :  { %206 = vmatpush.bf16.msra.mxu0 %v1034_v24 }
  0x2d   :  { %1128 = vmatpush.bf16.msra.mxu3 %v1034_v24  ;;  %352 = vperm.xlu2 %1154, %v1183_v38  }
  0x2e   :  { %357 = vperm.xlu0 %1152, %v1171_v26   ;;  %722 = vmatpush.bf16.msra.mxu2 %v1425_v57  ;;  %v921_v26 = vor.u32 %v1046_v22, %v918_v25 }
  0x2f   :  { %207 = vmatmul.bf16.vlgmr.msra.gmra.mxu0 %v1026_v27  ;;  %673 = vmatpush.bf16.msra.mxu1 %v1060_v3 }
  0x30   :  { %237 = vmatmul.bf16.vlgmr.msra.gmra.mxu3 %v1032_v28  ;;  %312 = vperm.xlu1 %1153, %v1173_v30  }
  0x31   :  { %1129 = vmatpush.bf16.msrb.mxu3 %v1065_v52 }
  0x32   :  { %723 = vmatpush.bf16.msra.mxu2 %v1067_v61 }
  0x33   :  { %674 = vmatpush.bf16.msra.mxu1 %v1059_v4 }
  0x35   :  { %317 = vperm.xlu2 %1154, %v1185_v43   ;;  %1130 = vmatpush.bf16.msrb.mxu3 %v1064_v54 }
  0x36   :  { %322 = vperm.xlu0 %1152, %v1175_v34   ;;  %724 = vmatpush.bf16.msra.mxu2 %v1440_v63  ;;  %v415_v34 = vld [vmem:[#allocation8 + $0x1c] sm:$0xf] }
  0x37   :  { %675 = vmatpush.bf16.msra.mxu1 %v1058_v7  ;;  %431 = vst [vmem:[#allocation2 + $0x3c] sm:$0xf] %v415_v34 }
  0x38   :  { %327 = vperm.xlu1 %1153, %v1179_v36  }
  0x39   :  { %1131 = vmatpush.bf16.msrb.mxu3 %v1063_v56  ;;  %725 = vmatmul.bf16.vlgmr.msra.gmra.mxu2 %v905_v2  ;;  %v422_v2 = vld [vmem:[#allocation8 + $0x38] sm:$0xf] }
  0x3a   :  { %438 = vst [vmem:[#allocation2 + $0x74] sm:$0xf] %v422_v2 }
  0x3d   :  { %332 = vperm.xlu2 %1154, %v1187_v44   ;;  %1132 = vmatpush.bf16.msrb.mxu3 %v1062_v60 }
  0x3e   :  { %337 = vperm.xlu0 %1152, %v1181_v37   ;;  %v420_v37 = vld [vmem:[#allocation8 + $0x30] sm:$0xf] }
  0x3f   :  { %212 = vmatmul.bf16.gmra.mxu0 %v1027_v39  ;;  %v421_v39 = vld [vmem:[#allocation8 + $0x34] sm:$0xf]  ;;  %436 = vst [vmem:[#allocation2 + $0x64] sm:$0xf] %v420_v37 }
  0x40   :  { %242 = vmatmul.bf16.gmra.mxu3 %v1033_v40  ;;  %437 = vst [vmem:[#allocation2 + $0x6c] sm:$0xf] %v421_v39 }
  0x41   :  { %1133 = vmatpush.bf16.msrb.mxu3 %v1061_v62  ;;  %v416_v62 = vld [vmem:[#allocation8 + $0x20] sm:$0xf] }
  0x42   :  { %432 = vst [vmem:[#allocation2 + $0x44] sm:$0xf] %v416_v62 }
  0x45   :  { %1134 = vmatpush.bf16.msrb.mxu3 %v1060_v3 }
  0x49   :  { %1135 = vmatpush.bf16.msrb.mxu3 %v1059_v4  ;;  %730 = vmatmul.bf16.gmra.mxu2 %v913_v10  ;;  %v423_v4 = vld [vmem:[#allocation8 + $0x3c] sm:$0xf]  ;;  %v1050_v10 = vld [vmem:[#allocation2 + $0x44] sm:$0xf] }
  0x4a   :  { %439 = vst [vmem:[#allocation2 + $0x7c] sm:$0xf] %v423_v4 }
  0x4d   :  { %1136 = vmatpush.bf16.msrb.mxu3 %v1058_v7 }
  0x4f   :  { %217 = vmatmul.bf16.gmra.mxu0 %v1028_v45 }
  0x51   :  { %1137 = vmatpush.bf16.msra.mxu3 %v1073_v48 }
  0x55   :  { %1138 = vmatpush.bf16.msra.mxu3 %v1072_v49 }
  0x59   :  { %1139 = vmatpush.bf16.msra.mxu3 %v1071_v51  ;;  %735 = vmatmul.bf16.gmra.mxu2 %v921_v26 }
  0x5d   :  { %1140 = vmatpush.bf16.msra.mxu3 %v1070_v53  ;;  %v926_v53 = vld [vmem:[#allocation2 + $0x38] sm:$0xf0] }
  0x5f   :  { %222 = vmatmul.bf16.gmra.mxu0 %v1029_v46 }
  0x61   :  { %1141 = vmatpush.bf16.msra.mxu3 %v1069_v55 }
  0x65   :  { %1142 = vmatpush.bf16.msra.mxu3 %v1425_v57 }
  0x69   :  { %1143 = vmatpush.bf16.msra.mxu3 %v1067_v61 }
  0x6d   :  { %1144 = vmatpush.bf16.msra.mxu3 %v1440_v63  ;;  %v417_v63 = vld [vmem:[#allocation8 + $0x24] sm:$0xf] }
  0x6e   :  { %433 = vst [vmem:[#allocation2 + $0x4c] sm:$0xf] %v417_v63 }
  0x6f   :  { %227 = vmatmul.bf16.gmra.mxu0 %v1030_v47 }
  0x77   :  { %v343_v16 = vpop.permute.xlu2 %342 }
  0x7f   :  { %232 = vmatmul.bf16.gmra.mxu0 %v1031_v50  ;;  %v348_v28 = vpop.permute.xlu2 %347  ;;  %v1048_v50 = vld [vmem:[#allocation2 + $0x34] sm:$0xf] }
  0x80   :  { %v929_v55 = vor.u32 %v1048_v50, %v926_v53 }
  0x82   :  { %740 = vmatmul.bf16.gmra.mxu2 %v929_v55 }
  0x87   :  { %v353_v44 = vpop.permute.xlu2 %352 }
  0x88   :  { %v283_v11 = vpop.permute.xlu0 %282 }
  0x8a   :  { %v293_v29 = vpop.permute.xlu1 %292 }
  0x90   :  { %v288_v20 = vpop.permute.xlu0 %287 }
  0x92   :  { %v298_v47 = vpop.permute.xlu1 %297 }
  0x98   :  { %v303_v40 = vpop.permute.xlu0 %302 }
  0x9a   :  { %v308_v8 = vpop.permute.xlu1 %307 }
  0xa0   :  { %v358_v58 = vpop.permute.xlu0 %357 }
  0xa8   :  { %v323_v37 = vpop.permute.xlu0 %322 }
  0xac   :  { %v208_v12 = vpop.f32.mrf.mxu0 }
  0xad   :  { %v360_v15 = vmul.f32 %v283_v11, %v208_v12  ;;  %v934_v12 = vld [vmem:[#allocation2 + $0x48] sm:$0xf0] }
  0xaf   :  { %v376_v17 = vpack.c.bf16 %v360_v15, %v360_v15  ;;  %v937_v15 = vor.u32 %v1050_v10, %v934_v12 }
  0xb1   :  { %392 = vst [vmem:[#allocation2] sm:$0xf] %v376_v17  ;;  %745 = vmatmul.bf16.gmra.mxu2 %v937_v15 }
  0xb3   :  { %v238_v18 = vpop.f32.mrf.mxu3 }
  0xb4   :  { %v372_v19 = vmul.f32 %v343_v16, %v238_v18  ;;  %v210_v21 = vpop.f32.mrf.mxu0  ;;  %v313_v18 = vpop.permute.xlu1 %312 }
  0xb5   :  { %v361_v24 = vmul.f32 %v288_v20, %v210_v21  ;;  %v418_v20 = vld [vmem:[#allocation8 + $0x28] sm:$0xf]  ;;  %v419_v21 = vld [vmem:[#allocation8 + $0x2c] sm:$0xf] }
  0xb6   :  { %v388_v23 = vpack.c.bf16 %v372_v19, %v372_v19  ;;  %434 = vst [vmem:[#allocation2 + $0x54] sm:$0xf] %v418_v20 }
  0xb7   :  { %v377_v27 = vpack.c.bf16 %v361_v24, %v361_v24  ;;  %435 = vst [vmem:[#allocation2 + $0x5c] sm:$0xf] %v419_v21 }
  0xb8   :  { %404 = vst [vmem:[#allocation2 + $0x60] sm:$0xf] %v388_v23  ;;  %v900_v41 = vld [vmem:[#allocation2] sm:$0xf] }
  0xb9   :  { %393 = vst [vmem:[#allocation2 + $0x8] sm:$0xf] %v377_v27  ;;  %v1054_v27 = vld [vmem:[#allocation2 + $0x64] sm:$0xf] }
  0xbb   :  { %v240_v30 = vpop.f32.mrf.mxu3 }
  0xbc   :  { %v373_v31 = vmul.f32 %v348_v28, %v240_v30  ;;  %v213_v32 = vpop.f32.mrf.mxu0  ;;  %v950_v28 = vld [vmem:[#allocation2 + $0x68] sm:$0xf0] }
  0xbd   :  { %v362_v36 = vmul.f32 %v293_v29, %v213_v32  ;;  %v318_v29 = vpop.permute.xlu2 %317  ;;  %v953_v33 = vor.u32 %v1054_v27, %v950_v28 }
  0xbe   :  { %v389_v35 = vpack.c.bf16 %v373_v31, %v373_v31  ;;  %v1052_v31 = vld [vmem:[#allocation2 + $0x54] sm:$0xf]  ;;  %v942_v34 = vld [vmem:[#allocation2 + $0x58] sm:$0xf0] }
  0xbf   :  { %v378_v38 = vpack.c.bf16 %v362_v36, %v362_v36  ;;  %v948_v49 = vld [vmem:[#allocation2 + $0x60] sm:$0xf] }
  0xc0   :  { %405 = vst [vmem:[#allocation2 + $0x68] sm:$0xf] %v389_v35  ;;  %v1043_v42 = vld [vmem:[#allocation2 + $0x4] sm:$0xf0]  ;;  %v945_v35 = vor.u32 %v1052_v31, %v942_v34 }
  0xc1   :  { %394 = vst [vmem:[#allocation2 + $0x10] sm:$0xf] %v378_v38  ;;  %v901_v43 = vor.u32 %v1043_v42, %v900_v41 }
  0xc2   :  { %750 = vmatmul.bf16.gmra.mxu2 %v945_v35 }
  0xc3   :  { %v243_v45 = vpop.f32.mrf.mxu3  ;;  %676 = vmatmul.bf16.vlgmr.msra.gmra.mxu1 %v901_v43 }
  0xc4   :  { %v374_v46 = vmul.f32 %v353_v44, %v243_v45  ;;  %v215_v48 = vpop.f32.mrf.mxu0  ;;  %v1056_v44 = vld [vmem:[#allocation2 + $0x74] sm:$0xf]  ;;  %v958_v45 = vld [vmem:[#allocation2 + $0x78] sm:$0xf0] }
  0xc5   :  { %v363_v52 = vmul.f32 %v298_v47, %v215_v48 }
  0xc6   :  { %v390_v51 = vpack.c.bf16 %v374_v46, %v374_v46  ;;  %v328_v46 = vpop.permute.xlu1 %327 }
  0xc7   :  { %v1055_v54 = vld [vmem:[#allocation2 + $0x64] sm:$0xf0]  ;;  %v379_v56 = vpack.c.bf16 %v363_v52, %v363_v52 }
  0xc8   :  { %406 = vst [vmem:[#allocation2 + $0x70] sm:$0xf] %v390_v51  ;;  %v949_v57 = vor.u32 %v1055_v54, %v948_v49  ;;  %v908_v5 = vld [vmem:[#allocation2 + $0x10] sm:$0xf]  ;;  %v961_v49 = vor.u32 %v1056_v44, %v958_v45  ;;  %v333_v51 = vpop.permute.xlu2 %332 }
  0xc9   :  { %395 = vst [vmem:[#allocation2 + $0x18] sm:$0xf] %v379_v56 }
  0xca   :  { %706 = vmatmul.bf16.vlgmr.msrb.gmra.mxu3 %v949_v57 }
  0xcb   :  { %v245_v59 = vpop.f32.mrf.mxu3 }
  0xcc   :  { %v375_v60 = vmul.f32 %v358_v58, %v245_v59  ;;  %v218_v61 = vpop.f32.mrf.mxu0  ;;  %v338_v58 = vpop.permute.xlu0 %337 }
  0xcd   :  { %v364_v1 = vmul.f32 %v303_v40, %v218_v61 }
  0xce   :  { %v391_v0 = vpack.c.bf16 %v375_v60, %v375_v60 }
  0xcf   :  { %v380_v3 = vpack.c.bf16 %v364_v1, %v364_v1  ;;  %v956_v13 = vld [vmem:[#allocation2 + $0x70] sm:$0xf]  ;;  %v726_v1 = vpop.f32.mrf.mxu2 }
  0xd0   :  { %407 = vst [vmem:[#allocation2 + $0x78] sm:$0xf] %v391_v0  ;;  %v1045_v6 = vld [vmem:[#allocation2 + $0x14] sm:$0xf0] }
  0xd1   :  { %396 = vst [vmem:[#allocation2 + $0x20] sm:$0xf] %v380_v3  ;;  %v909_v7 = vor.u32 %v1045_v6, %v908_v5  ;;  %v1457_v5 = vld [vmem:[%s1486_s5] ss:$0 sm:$0xff]  ;;  %s1296_s5 = smov [#allocation9]  }
  0xd2   :  { %s818_s24 = sshll.u32 %s1296_s5, 4  ;;  %s819_s24 = int_to_ptr.vmem [resolvable:$true] %s818_s24 }
  0xd3   :  { %681 = vmatmul.bf16.gmra.mxu1 %v909_v7 }
  0xd4   :  { %v220_v9 = vpop.f32.mrf.mxu0 }
  0xd5   :  { %v365_v11 = vmul.f32 %v308_v8, %v220_v9 }
  0xd7   :  { %v1057_v14 = vld [vmem:[#allocation2 + $0x74] sm:$0xf0]  ;;  %v381_v16 = vpack.c.bf16 %v365_v11, %v365_v11  ;;  %v728_v2 = vpop.f32.mrf.mxu2 }
  0xd8   :  { %v957_v17 = vor.u32 %v1057_v14, %v956_v13  ;;  %v916_v24 = vld [vmem:[#allocation2 + $0x20] sm:$0xf] }
  0xd9   :  { %397 = vst [vmem:[#allocation2 + $0x28] sm:$0xf] %v381_v16 }
  0xda   :  { %711 = vmatmul.bf16.gmra.mxu3 %v957_v17 }
  0xdc   :  { %v223_v19 = vpop.f32.mrf.mxu0 }
  0xdd   :  { %v366_v22 = vmul.f32 %v313_v18, %v223_v19 }
  0xdf   :  { %v382_v23 = vpack.c.bf16 %v366_v22, %v366_v22  ;;  %v731_v4 = vpop.f32.mrf.mxu2 }
  0xe0   :  { %v1047_v25 = vld [vmem:[#allocation2 + $0x24] sm:$0xf0] }
  0xe1   :  { %398 = vst [vmem:[#allocation2 + $0x30] sm:$0xf] %v382_v23  ;;  %v917_v26 = vor.u32 %v1047_v25, %v916_v24 }
  0xe3   :  { %686 = vmatmul.bf16.gmra.mxu1 %v917_v26 }
  0xe4   :  { %v225_v30 = vpop.f32.mrf.mxu0 }
  0xe5   :  { %v367_v32 = vmul.f32 %v318_v29, %v225_v30 }
  0xe7   :  { %v383_v36 = vpack.c.bf16 %v367_v32, %v367_v32  ;;  %v733_v10 = vpop.f32.mrf.mxu2 }
  0xe8   :  { %v924_v41 = vld [vmem:[#allocation2 + $0x30] sm:$0xf] }
  0xe9   :  { %399 = vst [vmem:[#allocation2 + $0x38] sm:$0xf] %v383_v36 }
  0xea   :  { %755 = vmatmul.bf16.vlgmr.msra.gmra.mxu3 %v953_v33 }
  0xec   :  { %v228_v38 = vpop.f32.mrf.mxu0 }
  0xed   :  { %v368_v39 = vmul.f32 %v323_v37, %v228_v38 }
  0xef   :  { %v384_v40 = vpack.c.bf16 %v368_v39, %v368_v39  ;;  %v736_v18 = vpop.f32.mrf.mxu2 }
  0xf0   :  { %v1049_v42 = vld [vmem:[#allocation2 + $0x34] sm:$0xf0] }
  0xf1   :  { %400 = vst [vmem:[#allocation2 + $0x40] sm:$0xf] %v384_v40  ;;  %v925_v43 = vor.u32 %v1049_v42, %v924_v41 }
  0xf3   :  { %691 = vmatmul.bf16.gmra.mxu1 %v925_v43 }
  0xf4   :  { %v230_v47 = vpop.f32.mrf.mxu0 }
  0xf5   :  { %v369_v48 = vmul.f32 %v328_v46, %v230_v47 }
  0xf7   :  { %v385_v50 = vpack.c.bf16 %v369_v48, %v369_v48  ;;  %v738_v27 = vpop.f32.mrf.mxu2 }
  0xf8   :  { %v932_v55 = vld [vmem:[#allocation2 + $0x40] sm:$0xf] }
  0xf9   :  { %401 = vst [vmem:[#allocation2 + $0x48] sm:$0xf] %v385_v50 }
  0xfa   :  { %760 = vmatmul.bf16.gmra.mxu3 %v961_v49 }
  0xfc   :  { %v233_v52 = vpop.f32.mrf.mxu0 }
  0xfd   :  { %v370_v53 = vmul.f32 %v333_v51, %v233_v52 }
  0xff   :  { %v386_v54 = vpack.c.bf16 %v370_v53, %v370_v53 }
 0x100   :  { %v1051_v56 = vld [vmem:[#allocation2 + $0x44] sm:$0xf0] }
 0x101   :  { %402 = vst [vmem:[#allocation2 + $0x50] sm:$0xf] %v386_v54  ;;  %v933_v57 = vor.u32 %v1051_v56, %v932_v55 }
 0x103   :  { %696 = vmatmul.bf16.gmra.mxu1 %v933_v57 }
 0x104   :  { %v235_v59 = vpop.f32.mrf.mxu0 }
 0x105   :  { %v371_v60 = vmul.f32 %v338_v58, %v235_v59  ;;  %v741_v33 = vpop.f32.mrf.mxu2 }
 0x107   :  { %v387_v61 = vpack.c.bf16 %v371_v60, %v371_v60 }
 0x108   :  { %v940_v62 = vld [vmem:[#allocation2 + $0x50] sm:$0xf] }
 0x109   :  { %403 = vst [vmem:[#allocation2 + $0x58] sm:$0xf] %v387_v61 }
 0x10d   :  { %v743_v43 = vpop.f32.mrf.mxu2 }
 0x110   :  { %v1053_v63 = vld [vmem:[#allocation2 + $0x54] sm:$0xf0] }
 0x111   :  { %v941_v0 = vor.u32 %v1053_v63, %v940_v62 }
 0x113   :  { %701 = vmatmul.bf16.gmra.mxu1 %v941_v0 }
 0x134   :  { %v746_v56 = vpop.f32.mrf.mxu2 }
 0x140   :  { %v677_v3 = vpop.f32.mrf.mxu1 }
 0x141   :  { %v678_v6 = vadd.f32 %v1457_v5, %v677_v3 }
 0x143   :  { %v727_v8 = vadd.f32 %v726_v1, %v678_v6 }
 0x145   :  { %v766_v13 = vmax.f32 %v727_v8, 0.0 }
 0x148   :  { %v679_v7 = vpop.f32.mrf.mxu1 }
 0x149   :  { %v680_v9 = vadd.f32 %v1457_v5, %v679_v7 }
 0x14b   :  { %v729_v11 = vadd.f32 %v728_v2, %v680_v9 }
 0x14d   :  { %v707_v12 = vpop.f32.mrf.mxu3  ;;  %v767_v14 = vmax.f32 %v729_v11, 0.0 }
 0x14e   :  { %v708_v42 = vadd.f32 %v1457_v5, %v707_v12 }
 0x14f   :  { %v1077_v15 = vpack.c.bf16 %v767_v14, %v766_v13 }
 0x150   :  { %v682_v16 = vpop.f32.mrf.mxu1 }
 0x151   :  { %1078 = vst [vmem:[#allocation9] sm:$0xff] %v1077_v15   ;;  %v683_v19 = vadd.f32 %v1457_v5, %v682_v16 }
 0x153   :  { %v732_v21 = vadd.f32 %v731_v4, %v683_v19  ;;  %v748_v4 = vpop.f32.mrf.mxu2 }
 0x155   :  { %v709_v17 = vpop.f32.mrf.mxu3  ;;  %v768_v25 = vmax.f32 %v732_v21, 0.0 }
 0x156   :  { %v710_v44 = vadd.f32 %v1457_v5, %v709_v17 }
 0x158   :  { %v684_v20 = vpop.f32.mrf.mxu1 }
 0x159   :  { %v685_v22 = vadd.f32 %v1457_v5, %v684_v20 }
 0x15b   :  { %v734_v23 = vadd.f32 %v733_v10, %v685_v22  ;;  %v751_v16 = vpop.f32.mrf.mxu2 }
 0x15d   :  { %v712_v24 = vpop.f32.mrf.mxu3  ;;  %v769_v26 = vmax.f32 %v734_v23, 0.0 }
 0x15e   :  { %v713_v62 = vadd.f32 %v1457_v5, %v712_v24 }
 0x15f   :  { %v1082_v28 = vpack.c.bf16 %v769_v26, %v768_v25 }
 0x160   :  { %v687_v29 = vpop.f32.mrf.mxu1 }
 0x161   :  { %1114 = vst [vmem:[#allocation9 + $0x8] sm:$0xff] %v1082_v28   ;;  %v688_v31 = vadd.f32 %v1457_v5, %v687_v29 }
 0x163   :  { %v737_v34 = vadd.f32 %v736_v18, %v688_v31  ;;  %v753_v22 = vpop.f32.mrf.mxu2 }
 0x165   :  { %v714_v30 = vpop.f32.mrf.mxu3  ;;  %v770_v38 = vmax.f32 %v737_v34, 0.0 }
 0x166   :  { %v715_v63 = vadd.f32 %v1457_v5, %v714_v30 }
 0x168   :  { %v689_v32 = vpop.f32.mrf.mxu1 }
 0x169   :  { %v690_v35 = vadd.f32 %v1457_v5, %v689_v32 }
 0x16b   :  { %v739_v36 = vadd.f32 %v738_v27, %v690_v35 }
 0x16d   :  { %v756_v37 = vpop.f32.mrf.mxu3  ;;  %v771_v39 = vmax.f32 %v739_v36, 0.0 }
 0x16e   :  { %v757_v45 = vadd.f32 %v756_v37, %v708_v42 }
 0x16f   :  { %v1087_v40 = vpack.c.bf16 %v771_v39, %v770_v38 }
 0x170   :  { %v692_v41 = vpop.f32.mrf.mxu1  ;;  %v778_v49 = vmax.f32 %v757_v45, 0.0 }
 0x171   :  { %1115 = vst [vmem:[#allocation9 + $0x10] sm:$0xff] %v1087_v40   ;;  %v693_v47 = vadd.f32 %v1457_v5, %v692_v41 }
 0x173   :  { %v742_v52 = vadd.f32 %v741_v33, %v693_v47 }
 0x175   :  { %v758_v46 = vpop.f32.mrf.mxu3  ;;  %v772_v58 = vmax.f32 %v742_v52, 0.0 }
 0x176   :  { %v759_v48 = vadd.f32 %v758_v46, %v710_v44 }
 0x178   :  { %v779_v50 = vmax.f32 %v759_v48, 0.0  ;;  %v694_v51 = vpop.f32.mrf.mxu1 }
 0x179   :  { %v695_v54 = vadd.f32 %v1457_v5, %v694_v51 }
 0x17a   :  { %v1107_v53 = vpack.c.bf16 %v779_v50, %v778_v49 }
 0x17b   :  { %v744_v55 = vadd.f32 %v743_v43, %v695_v54 }
 0x17c   :  { %1119 = vst [vmem:[#allocation9 + $0x30] sm:$0xff] %v1107_v53  }
 0x17d   :  { %v761_v57 = vpop.f32.mrf.mxu3  ;;  %v773_v59 = vmax.f32 %v744_v55, 0.0 }
 0x17e   :  { %v762_v0 = vadd.f32 %v761_v57, %v713_v62 }
 0x17f   :  { %v1092_v60 = vpack.c.bf16 %v773_v59, %v772_v58 }
 0x180   :  { %v697_v61 = vpop.f32.mrf.mxu1  ;;  %v780_v6 = vmax.f32 %v762_v0, 0.0 }
 0x181   :  { %1116 = vst [vmem:[#allocation9 + $0x18] sm:$0xff] %v1092_v60   ;;  %v698_v2 = vadd.f32 %v1457_v5, %v697_v61 }
 0x183   :  { %v747_v9 = vadd.f32 %v746_v56, %v698_v2 }
 0x185   :  { %v763_v1 = vpop.f32.mrf.mxu3  ;;  %v774_v13 = vmax.f32 %v747_v9, 0.0 }
 0x186   :  { %v764_v3 = vadd.f32 %v763_v1, %v715_v63 }
 0x188   :  { %v781_v7 = vmax.f32 %v764_v3, 0.0  ;;  %v699_v8 = vpop.f32.mrf.mxu1 }
 0x189   :  { %v700_v11 = vadd.f32 %v1457_v5, %v699_v8 }
 0x18a   :  { %v1112_v10 = vpack.c.bf16 %v781_v7, %v780_v6 }
 0x18b   :  { %v749_v12 = vadd.f32 %v748_v4, %v700_v11 }
 0x18c   :  { %1120 = vst [vmem:[#allocation9 + $0x38] sm:$0xff] %v1112_v10  }
 0x18d   :  { %v775_v14 = vmax.f32 %v749_v12, 0.0 }
 0x18f   :  { %v1097_v15 = vpack.c.bf16 %v775_v14, %v774_v13 }
 0x190   :  { %v702_v17 = vpop.f32.mrf.mxu1 }
 0x191   :  { %1117 = vst [vmem:[#allocation9 + $0x20] sm:$0xff] %v1097_v15   ;;  %v703_v18 = vadd.f32 %v1457_v5, %v702_v17 }
 0x193   :  { %v752_v20 = vadd.f32 %v751_v16, %v703_v18 }
 0x195   :  { %v776_v24 = vmax.f32 %v752_v20, 0.0 }
 0x198   :  { %v704_v19 = vpop.f32.mrf.mxu1 }
 0x199   :  { %v705_v21 = vadd.f32 %v1457_v5, %v704_v19 }
 0x19b   :  { %v754_v23 = vadd.f32 %v753_v22, %v705_v21 }
 0x19d   :  { %v777_v25 = vmax.f32 %v754_v23, 0.0 }
 0x19f   :  { %v1102_v26 = vpack.c.bf16 %v777_v25, %v776_v24 }
 0x1a1   :  { %1118 = vst [vmem:[#allocation9 + $0x28] sm:$0xff] %v1102_v26  }
 0x1a2   :  { %826 = dma.vmem_to_hbm [thread:$0]  %s819_s24, 1024, %s821_s27, [#allocation5], %s1291_s29, %s1291_s29, %s1292_s30  }
 0x1a3   :  { %1288 = dma.done.wait [#allocation5], 1024  }
 0x1a4   :  { %1289 = vsyncadd [#allocation5], 4294966272 }
 0x1a5   :  { %831 = vsyncpa [#allocation4], 1 }
 0x1a6   :  { %832 = vsyncpa [#allocation7], 1 }
 0x1a7   :  { %833 = vsyncpa [#allocation5], 1 }

</bundles_post_ra>
